<compile_context>
chip_gen: v7x
topology: tpu7x:2x2x1
jax: 0.10.0
libtpu: 0.0.40
codegen_flags: <defaults>
</compile_context>

<pallas_src>
import jax
import jax.numpy as jnp
from jax import lax
from jax.experimental import pallas as pl
from jax.experimental.pallas import tpu as pltpu

_LANES = 128
_UNROLL_C = 16  # static unroll threshold for the channel loop


def _dice_kernel(C):
    def kernel(smooth_ref, x_ref, t_ref, o_ref):
        # x_ref/t_ref: (tb, C, tr, 128); o_ref: (tb, tr, 128)
        smooth = smooth_ref[0]
        out_shape = o_ref.shape

        if C <= _UNROLL_C:
            # Stream one channel at a time from the Ref (no full-tile load).
            xc = x_ref[:, 0].astype(jnp.float32)
            tc = t_ref[:, 0].astype(jnp.float32)
            num = xc * tc
            den = xc * xc + tc * tc
            for c in range(1, C):
                xc = x_ref[:, c].astype(jnp.float32)
                tc = t_ref[:, c].astype(jnp.float32)
                num = num + xc * tc
                den = den + xc * xc + tc * tc
        else:
            zeros = jnp.zeros(out_shape, jnp.float32)

            def body(c, carry):
                num, den = carry
                xc = x_ref[:, pl.ds(c, 1)].reshape(out_shape).astype(jnp.float32)
                tc = t_ref[:, pl.ds(c, 1)].reshape(out_shape).astype(jnp.float32)
                return num + xc * tc, den + xc * xc + tc * tc

            num, den = lax.fori_loop(0, C, body, (zeros, zeros), unroll=2)

        num = num + smooth
        den = den + smooth
        # approx reciprocal -> EUP slot (kernel is HBM-bound; VALU stays idle).
        o_ref[...] = (1.0 - num * pl.reciprocal(den, approx=True)).astype(o_ref.dtype)

    return kernel


def _default_step_bytes():
    """Per-generation input-bytes budget per grid step."""
    try:
        kind = jax.devices()[0].device_kind.lower()
    except Exception:
        kind = ""
    if "v7" in kind:
        return 12 * 1024 * 1024  # 3.2 TB/s HBM: amortize ~0.35us/step overhead
    return 8 * 1024 * 1024       # v5e / v6e: already ~roofline at this size


def _choose_tiles(B, C, R, itemsize, target_step_bytes):
    """Pick (tb, tr): batch tile and row tile (rows of 128 lanes)."""
    gran = 8 if itemsize >= 4 else 16       # sublane packing for sub-32-bit dtypes
    bytes_per_row = 2 * C * _LANES * itemsize   # both inputs, one batch element
    budget_rows = max(1, target_step_bytes // bytes_per_row)

    if R <= budget_rows:
        # Whole spatial extent per step; group batch elements, but keep >=2 grid
        # steps along the batch axis when possible (v7x has 2 TensorCores).
        tr = R
        tb = 1
        max_tb = max(1, budget_rows // max(R, 1))
        if B >= 2:
            max_tb = min(max_tb, B // 2)
        for d in range(min(B, max_tb), 0, -1):
            if B % d == 0:
                tb = d
                break
        if B // tb == 1 and R >= 2 * gran:
            # Single batch step: split rows so the second core isn't idle.
            half = -(-R // 2)
            tr = max(gran, -(-half // gran) * gran)
    else:
        # Tile rows; last tile may be ragged (Pallas drops OOB writes).
        tb = 1
        tr = max(gran, (budget_rows // gran) * gran)
    return tb, tr


def dice_loss(inp, target, smooth=1.0, *, target_step_bytes=None):
    """inp, target: (B, C, H, W) (f32 or bf16). Returns (B, H, W) float32 loss map."""
    B, C, H, W = inp.shape
    HW = H * W
    R = pl.cdiv(HW, _LANES)
    hw_pad = R * _LANES
    itemsize = jnp.dtype(inp.dtype).itemsize
    if target_step_bytes is None:
        target_step_bytes = _default_step_bytes()
    tb, tr = _choose_tiles(B, C, R, itemsize, target_step_bytes)

    x = inp.reshape(B, C, HW)
    t = target.reshape(B, C, HW)
    if hw_pad != HW:  # <=127-element lane pad only; skipped when HW % 128 == 0
        pad = ((0, 0), (0, 0), (0, hw_pad - HW))
        x = jnp.pad(x, pad)
        t = jnp.pad(t, pad)
    x = x.reshape(B, C, R, _LANES)
    t = t.reshape(B, C, R, _LANES)

    smooth_arr = jnp.asarray([smooth], dtype=jnp.float32)
    grid = (pl.cdiv(B, tb), pl.cdiv(R, tr))

    # VMEM limit derived from actual tile bytes (double-buffered in/out + margin).
    in_block = tb * C * tr * _LANES * itemsize
    out_block = tb * tr * _LANES * 4
    need = 2 * (2 * in_block + out_block)
    vmem_limit = int(min(max(int(need * 1.5) + (2 << 20), 16 << 20), 64 << 20))

    out = pl.pallas_call(
        _dice_kernel(C),
        out_shape=jax.ShapeDtypeStruct((B, R, _LANES), jnp.float32),
        grid_spec=pltpu.PrefetchScalarGridSpec(
            num_scalar_prefetch=0,
            grid=grid,
            in_specs=[
                pl.BlockSpec(memory_space=pltpu.MemorySpace.SMEM),  # smooth scalar
                pl.BlockSpec((tb, C, tr, _LANES), lambda bi, rj: (bi, 0, rj, 0)),
                pl.BlockSpec((tb, C, tr, _LANES), lambda bi, rj: (bi, 0, rj, 0)),
            ],
            out_specs=pl.BlockSpec((tb, tr, _LANES), lambda bi, rj: (bi, rj, 0)),
        ),
        compiler_params=pltpu.CompilerParams(
            dimension_semantics=("parallel", "parallel"),
            vmem_limit_bytes=vmem_limit,
        ),
    )(smooth_arr, x, t)

    return out.reshape(B, hw_pad)[:, :HW].reshape(B, H, W)


if __name__ == "__main__":
    key = jax.random.PRNGKey(0)
    k1, k2 = jax.random.split(key)

    B, C, H, W = 2, 4, 16, 16
    smooth = 1.0  # cfg.smooth

    inp = jax.random.uniform(k1, (B, C, H, W), dtype=jnp.float32)
    tgt = (jax.random.uniform(k2, (B, C, H, W), dtype=jnp.float32) > 0.5).astype(
        jnp.float32
    )

    loss = dice_loss(inp, tgt, smooth=smooth)
    loss = jax.block_until_ready(loss)

    # Reference in plain JAX (mirrors PyTorch forward exactly).
    num_ref = jnp.sum(inp * tgt, axis=1) + smooth
    den_ref = jnp.sum(inp ** 2 + tgt ** 2, axis=1) + smooth
    ref = 1.0 - num_ref / den_ref

    assert loss.shape == (B, H, W)
    # approx reciprocal (EUP) -> ~2^-12 relative error; loosen tolerance.
    assert jnp.allclose(loss, ref, atol=2e-3, rtol=2e-3)
    print("KERNEL_OK")
</pallas_src>

<mosaic_0001>
module attributes {stable_mosaic.version = 11 : i64} {
  func.func @kernel(%arg0: i32, %arg1: i32, %arg2: memref<1xf32, #tpu.memory_space<smem>>, %arg3: memref<1x4x2x128xf32, #tpu.memory_space<vmem>>, %arg4: memref<1x4x2x128xf32, #tpu.memory_space<vmem>>, %arg5: memref<1x2x128xf32, #tpu.memory_space<vmem>>) attributes {dimension_semantics = [#tpu.dimension_semantics<parallel>, #tpu.dimension_semantics<parallel>], iteration_bounds = array<i64: 2, 1>, scalar_prefetch = 0 : i64, scratch_operands = 0 : i64, tpu.core_type = #tpu.core_type<tc>, window_params = [{transform_indices = @transform_0, window_bounds = array<i64: 1>}, {transform_indices = @transform_1, window_bounds = array<i64: 1, 4, 2, 128>}, {transform_indices = @transform_2, window_bounds = array<i64: 1, 4, 2, 128>}, {transform_indices = @transform_3, window_bounds = array<i64: 1, 2, 128>}]} {
    %c0 = arith.constant 0 : index
    %0 = memref.load %arg2[%c0] : memref<1xf32, #tpu.memory_space<smem>>
    %c0_0 = arith.constant 0 : index
    %c0_1 = arith.constant 0 : index
    %c0_2 = arith.constant 0 : index
    %c0_3 = arith.constant 0 : index
    %1 = vector.load %arg3[%c0_0, %c0_1, %c0_2, %c0_3] : memref<1x4x2x128xf32, #tpu.memory_space<vmem>>, vector<1x1x2x128xf32>
    %2 = vector.shape_cast %1 : vector<1x1x2x128xf32> to vector<1x2x128xf32>
    %c0_4 = arith.constant 0 : index
    %c0_5 = arith.constant 0 : index
    %c0_6 = arith.constant 0 : index
    %c0_7 = arith.constant 0 : index
    %3 = vector.load %arg4[%c0_4, %c0_5, %c0_6, %c0_7] : memref<1x4x2x128xf32, #tpu.memory_space<vmem>>, vector<1x1x2x128xf32>
    %4 = vector.shape_cast %3 : vector<1x1x2x128xf32> to vector<1x2x128xf32>
    %5 = arith.mulf %2, %4 : vector<1x2x128xf32>
    %6 = arith.mulf %2, %2 : vector<1x2x128xf32>
    %7 = arith.mulf %4, %4 : vector<1x2x128xf32>
    %8 = arith.addf %6, %7 : vector<1x2x128xf32>
    %c0_8 = arith.constant 0 : index
    %c1 = arith.constant 1 : index
    %c0_9 = arith.constant 0 : index
    %c0_10 = arith.constant 0 : index
    %9 = vector.load %arg3[%c0_8, %c1, %c0_9, %c0_10] : memref<1x4x2x128xf32, #tpu.memory_space<vmem>>, vector<1x1x2x128xf32>
    %10 = vector.shape_cast %9 : vector<1x1x2x128xf32> to vector<1x2x128xf32>
    %c0_11 = arith.constant 0 : index
    %c1_12 = arith.constant 1 : index
    %c0_13 = arith.constant 0 : index
    %c0_14 = arith.constant 0 : index
    %11 = vector.load %arg4[%c0_11, %c1_12, %c0_13, %c0_14] : memref<1x4x2x128xf32, #tpu.memory_space<vmem>>, vector<1x1x2x128xf32>
    %12 = vector.shape_cast %11 : vector<1x1x2x128xf32> to vector<1x2x128xf32>
    %13 = arith.mulf %10, %12 : vector<1x2x128xf32>
    %14 = arith.addf %5, %13 : vector<1x2x128xf32>
    %15 = arith.mulf %10, %10 : vector<1x2x128xf32>
    %16 = arith.addf %8, %15 : vector<1x2x128xf32>
    %17 = arith.mulf %12, %12 : vector<1x2x128xf32>
    %18 = arith.addf %16, %17 : vector<1x2x128xf32>
    %c0_15 = arith.constant 0 : index
    %c2 = arith.constant 2 : index
    %c0_16 = arith.constant 0 : index
    %c0_17 = arith.constant 0 : index
    %19 = vector.load %arg3[%c0_15, %c2, %c0_16, %c0_17] : memref<1x4x2x128xf32, #tpu.memory_space<vmem>>, vector<1x1x2x128xf32>
    %20 = vector.shape_cast %19 : vector<1x1x2x128xf32> to vector<1x2x128xf32>
    %c0_18 = arith.constant 0 : index
    %c2_19 = arith.constant 2 : index
    %c0_20 = arith.constant 0 : index
    %c0_21 = arith.constant 0 : index
    %21 = vector.load %arg4[%c0_18, %c2_19, %c0_20, %c0_21] : memref<1x4x2x128xf32, #tpu.memory_space<vmem>>, vector<1x1x2x128xf32>
    %22 = vector.shape_cast %21 : vector<1x1x2x128xf32> to vector<1x2x128xf32>
    %23 = arith.mulf %20, %22 : vector<1x2x128xf32>
    %24 = arith.addf %14, %23 : vector<1x2x128xf32>
    %25 = arith.mulf %20, %20 : vector<1x2x128xf32>
    %26 = arith.addf %18, %25 : vector<1x2x128xf32>
    %27 = arith.mulf %22, %22 : vector<1x2x128xf32>
    %28 = arith.addf %26, %27 : vector<1x2x128xf32>
    %c0_22 = arith.constant 0 : index
    %c3 = arith.constant 3 : index
    %c0_23 = arith.constant 0 : index
    %c0_24 = arith.constant 0 : index
    %29 = vector.load %arg3[%c0_22, %c3, %c0_23, %c0_24] : memref<1x4x2x128xf32, #tpu.memory_space<vmem>>, vector<1x1x2x128xf32>
    %30 = vector.shape_cast %29 : vector<1x1x2x128xf32> to vector<1x2x128xf32>
    %c0_25 = arith.constant 0 : index
    %c3_26 = arith.constant 3 : index
    %c0_27 = arith.constant 0 : index
    %c0_28 = arith.constant 0 : index
    %31 = vector.load %arg4[%c0_25, %c3_26, %c0_27, %c0_28] : memref<1x4x2x128xf32, #tpu.memory_space<vmem>>, vector<1x1x2x128xf32>
    %32 = vector.shape_cast %31 : vector<1x1x2x128xf32> to vector<1x2x128xf32>
    %33 = arith.mulf %30, %32 : vector<1x2x128xf32>
    %34 = arith.addf %24, %33 : vector<1x2x128xf32>
    %35 = arith.mulf %30, %30 : vector<1x2x128xf32>
    %36 = arith.addf %28, %35 : vector<1x2x128xf32>
    %37 = arith.mulf %32, %32 : vector<1x2x128xf32>
    %38 = arith.addf %36, %37 : vector<1x2x128xf32>
    %39 = vector.broadcast %0 : f32 to vector<1x2x128xf32>
    %40 = arith.addf %34, %39 : vector<1x2x128xf32>
    %41 = vector.broadcast %0 : f32 to vector<1x2x128xf32>
    %42 = arith.addf %38, %41 : vector<1x2x128xf32>
    %43 = tpu.reciprocal %42 {approx = true} : vector<1x2x128xf32> -> vector<1x2x128xf32>
    %44 = arith.mulf %40, %43 : vector<1x2x128xf32>
    %cst = arith.constant 1.000000e+00 : f32
    %45 = vector.broadcast %cst : f32 to vector<1x2x128xf32>
    %46 = arith.subf %45, %44 : vector<1x2x128xf32>
    %c0_29 = arith.constant 0 : index
    %c0_30 = arith.constant 0 : index
    %c0_31 = arith.constant 0 : index
    %47 = vector.load %arg5[%c0_29, %c0_30, %c0_31] : memref<1x2x128xf32, #tpu.memory_space<vmem>>, vector<1x2x128xf32>
    tpu.vector_store %arg5[%c0_29, %c0_30, %c0_31], %46 {strides = array<i32>} : memref<1x2x128xf32, #tpu.memory_space<vmem>>, vector<1x2x128xf32>,
    return
  }
  func.func @transform_0(%arg0: i32, %arg1: i32) -> i32 {
    %c0_i32 = arith.constant 0 : i32
    %c0_i32_0 = arith.constant 0 : i32
    return %c0_i32 : i32
  }
  func.func @transform_1(%arg0: i32, %arg1: i32) -> (i32, i32, i32, i32) {
    %c0_i32 = arith.constant 0 : i32
    %c0_i32_0 = arith.constant 0 : i32
    %c0_i32_1 = arith.constant 0 : i32
    return %arg0, %c0_i32, %arg1, %c0_i32_0 : i32, i32, i32, i32
  }
  func.func @transform_2(%arg0: i32, %arg1: i32) -> (i32, i32, i32, i32) {
    %c0_i32 = arith.constant 0 : i32
    %c0_i32_0 = arith.constant 0 : i32
    %c0_i32_1 = arith.constant 0 : i32
    return %arg0, %c0_i32, %arg1, %c0_i32_0 : i32, i32, i32, i32
  }
  func.func @transform_3(%arg0: i32, %arg1: i32) -> (i32, i32, i32) {
    %c0_i32 = arith.constant 0 : i32
    %c0_i32_0 = arith.constant 0 : i32
    return %arg0, %arg1, %c0_i32 : i32, i32, i32
  }
}

</mosaic_0001>

<bundles_post_ra>
// kernel: tpu_custom_call.1
= control target key start
LH: loop header
LB: loop body
LE: loop exit
PB: predicated region body
PF: predicated region fallthrough
CT: control target
= control target key end

     0   :  { %s923_s0 = inlined_call_operand.<no memory space> [shape: f32[1], index: 0, kind: input, shape index: {}]   ;;  %s924_s1 = inlined_call_operand.hbm [shape: f32[2,4,2,128], index: 1, kind: input, shape index: {}]   ;;  %s925_s2 = inlined_call_operand.hbm [shape: f32[2,4,2,128], index: 2, kind: input, shape index: {}]   ;;  %s926_s3 = inlined_call_operand.hbm [shape: f32[2,2,128], index: 3, kind: output, shape index: {}]  }
   0x1   :  { %8 = sst [smem:[#allocation2]] %s923_s0 }
   0x2   :  { %9 = vsyncpa [#allocation4], 0 }
   0x3   :  { %11 = vsyncpa [#allocation4 + $0x1], 0 }
   0x4   :  { %12 = vsyncpa [#allocation7], 0 }
   0x5   :  { %14 = vsyncpa [#allocation7 + $0x1], 0 }
   0x6   :  { %15 = vsyncpa [#allocation5], 0 }
   0x7   :  { %17 = vsyncpa [#allocation5 + $0x1], 0  ;;  %s688_s14 = smov 0   ;;  %s690_s15 = smov 0  }
   0x8   :  { %s692_s16 = smov 0   ;;  %s694_s17 = smov 0  }
   0x9   :  { %s696_s18 = smov 0   ;;  %s698_s19 = smov 0  }
   0xa LB: > { %s415_s0 = sadd.s32 4294967295, %s658_s19   ;;  %s416_s20 = sadd.s32 4294967294, %s658_s19   ;;  %s658_s19 = sphi %s698_s19, %s23_s19   ;;  %s654_s18 = sphi %s696_s18, %s944_s18   ;;  %s650_s17 = sphi %s694_s17, %s943_s17   ;;  %s646_s16 = sphi %s692_s16, %s942_s16   ;;  %s642_s15 = sphi %s690_s15, %s941_s15   ;;  %s638_s14 = sphi %s688_s14, %s940_s14  }
   0xb   : > { %s35_s21 = sadd.s32 1, %s654_s18  ;;  %s65_s22 = sadd.s32 1, %s646_s16 }
   0xc   : > { %p37_p0 = scmp.ge.s32.totalorder %s35_s21, 2  ;;  %p72_p1 = scmp.ne.s32.totalorder %s646_s16, %s642_s15 }
   0xd   : > { %p73_p2 = scmp.eq.s32.totalorder %s658_s19, 0  ;;  %p78_p3 = scmp.ne.s32.totalorder %s642_s15, %s638_s14 }
   0xe   : > { %s946_s21 = smov (%p37_p0, %s35_s21), 0  ;;  %p79_p5 = scmp.eq.s32.totalorder %s415_s0, 0 }
   0xf   : > { %p729_p4 = por %p73_p2, %p72_p1  ;;  %s60_s24 = ssub.s32 %s654_s18, %s946_s21 }
  0x10   : > { %p132_p6 = scmp.eq.s32.totalorder %s415_s0, 1  ;;  %p63_p7 = scmp.eq.s32.totalorder %s60_s24, 0 }
  0x11   : > { %p735_p8 = por %p79_p5, %p78_p3  ;;  %p138_p10 = scmp.eq.s32.totalorder %s416_s20, 1 }
  0x12   : > { %p739_p9 = por %p132_p6, %p72_p1  ;;  %p458_p13 = scmp.lt.s32.totalorder %s658_s19, 2 }
  0x13   : > { %s930_s25 = scalar_select %p735_p8, 1, 0 }
  0x14   : > { %s931_s26 = scalar_select %p739_p9, 1, 0 }
  0x15   : > { %s744_s27 = scalar_select %p63_p7, %s646_s16, %s65_s22  }
  0x16   : > { %p746_p11 = por %p138_p10, %p78_p3  ;;  %s753_s29 = sand.u32 1, %s646_s16  }
  0x17   : > { %s419_s30 = sshll.u32 %s753_s29, 3  ;;  %s439_s4 = sshll.u32 %s654_s18, 7 }
  0x18   : > { %s932_s28 = scalar_select %p746_p11, 1, 0 }
  0x19   : > { %s762_s7 = scalar_lea.hbm %s924_s1, %s439_s4  ;;  %s165_s8 = scalar_lea.vmem [#allocation3], %s419_s30 }
  0x1a   : > { %s173_s9 = sshll.u32 %s165_s8, 4  ;;  %p770_p0 = pnand %p458_p13, %p729_p4  ;;  %s766_s9 = int_to_ptr.vmem [resolvable:$true] %s173_s9 }
  0x1b   : > { %s162_s11 = scalar_lea.sflag [#allocation4], %s753_s29  ;;  %s512_s12 = scalar_lea.hbm %s762_s7, 128 }
  0x1c   : > { %p513_p2 = scmp.ne.s32.totalorder %s762_s7, %s512_s12  ;;  %p514_p3 = pneg %p770_p0 }
  0x1d   : > { %s517_s20 = scalar_lea.hbm %s924_s1, 256  ;;  %p518_p4 = scmp.lt.u32.totalorder %s762_s7, %s924_s1 }
  0x1e   : > { %p515_p5 = pnand %p514_p3, %p513_p2  ;;  %p519_p7 = scmp.lt.u32.totalorder %s517_s20, %s512_s12 }
  0x1f   : > { %p521_p13 = scmp.lt.u32.totalorder %s512_s12, %s762_s7 }
  0x20   : > { %p516_p6 = pneg %p515_p5  ;;  %p520_p10 = por %p519_p7, %p518_p4 }
  0x22   : > { %p522_p12 = por %p521_p13, %p520_p10 }
  0x24   : > { %p523_p1 = pnand %p522_p12, %p516_p6 }
  0x26   : > { %526 = shalt.err (!%p523_p1)
}
  0x27   : > { %s527_s24 = scalar_lea.vmem %s766_s9, 128  ;;  %s660_s5 = smov [#allocation3]  }
  0x28   : > { %p528_p2 = scmp.ne.s32.totalorder %s766_s9, %s527_s24  ;;  %s532_s6 = sshll.u32 %s660_s5, 4  ;;  %s533_s6 = int_to_ptr.vmem [resolvable:$false] %s532_s6 }
  0x29   : > { %s534_s8 = scalar_lea.vmem %s533_s6, 256  ;;  %p535_p9 = scmp.lt.s32.totalorder %s766_s9, %s533_s6 }
  0x2a   : > { %p530_p5 = pnand %p528_p2, %p514_p3  ;;  %p536_p4 = scmp.lt.s32.totalorder %s534_s8, %s527_s24 }
  0x2c   : > { %p531_p11 = pneg %p530_p5  ;;  %p537_p7 = por %p536_p4, %p535_p9 }
  0x2e   : > { %p538_p10 = pnand %p537_p7, %p531_p11 }
  0x30   : > { %541 = shalt.err (!%p538_p10)
}
  0x31   : > { %s661_s12 = smov 32   ;;  %s662_s13 = smov 2  }
  0x32   : > { %450 = dma.hbm_to_vmem [thread:$0]  (!%p770_p0), %s762_s7, 128, %s766_s9, %s162_s11, %s661_s12, %s661_s12, %s662_s13  }
  0x33   : > { %p203_p9 = scmp.lt.s32.totalorder %s658_s19, 3  ;;  %s812_s22 = scalar_lea.hbm %s925_s2, %s439_s4 }
  0x34   : > { %p934_p11 = scmp.ge.s32.totalorder %s658_s19, 1  ;;  %s187_s24 = scalar_lea.vmem [#allocation6], %s419_s30 }
  0x35   : > { %s195_s5 = sshll.u32 %s187_s24, 4  ;;  %s184_s7 = scalar_lea.sflag [#allocation7], %s753_s29  ;;  %s822_s5 = int_to_ptr.vmem [resolvable:$true] %s195_s5 }
  0x36   : > { %p816_p12 = pnand %p934_p11, %p203_p9  ;;  %s542_s9 = scalar_lea.hbm %s812_s22, 128 }
  0x37   : > { %p543_p1 = scmp.ne.s32.totalorder %s812_s22, %s542_s9  ;;  %s547_s6 = scalar_lea.hbm %s925_s2, 256 }
  0x38   : > { %p548_p2 = scmp.lt.u32.totalorder %s812_s22, %s925_s2  ;;  %p549_p5 = scmp.lt.u32.totalorder %s547_s6, %s542_s9 }
  0x39   : > { %p545_p6 = pnand %p543_p1, %p514_p3  ;;  %p551_p7 = scmp.lt.u32.totalorder %s542_s9, %s812_s22 }
  0x3a   : > { %p550_p4 = por %p549_p5, %p548_p2 }
  0x3b   : > { %p546_p13 = pneg %p545_p6 }
  0x3c   : > { %p552_p10 = por %p551_p7, %p550_p4 }
  0x3e   : > { %p553_p9 = pnand %p552_p10, %p546_p13 }
  0x40   : > { %556 = shalt.err (!%p553_p9)
}
  0x41   : > { %s557_s30 = scalar_lea.vmem %s822_s5, 128  ;;  %s663_s20 = smov [#allocation6]  }
  0x42   : > { %p558_p11 = scmp.ne.s32.totalorder %s822_s5, %s557_s30  ;;  %s562_s24 = sshll.u32 %s663_s20, 4  ;;  %s563_s24 = int_to_ptr.vmem [resolvable:$false] %s562_s24 }
  0x43   : > { %s564_s4 = scalar_lea.vmem %s563_s24, 256  ;;  %p565_p8 = scmp.lt.s32.totalorder %s822_s5, %s563_s24 }
  0x44   : > { %p560_p1 = pnand %p558_p11, %p514_p3  ;;  %p566_p2 = scmp.lt.s32.totalorder %s564_s4, %s557_s30 }
  0x46   : > { %p561_p6 = pneg %p560_p1  ;;  %p567_p5 = por %p566_p2, %p565_p8 }
  0x48   : > { %p568_p4 = pnand %p567_p5, %p561_p6 }
  0x4a   : > { %571 = shalt.err (!%p568_p4)
}
  0x4b   : > { %453 = dma.hbm_to_vmem [thread:$0]  (!%p770_p0), %s812_s22, 128, %s822_s5, %s184_s7, %s661_s12, %s661_s12, %s662_s13  }
  0x4c   : > { %207 = sbr.rel (%p816_p12) target bundleno = 134 (0x86), region = 32  ;;  %s856_s9 = sand.u32 (!%p816_p12), 1, %s642_s15  }
  0x4d   : > { %s426_s11 = sshll.u32 (!%p816_p12), %s856_s9, 3  ;;  %s210_s6 = scalar_lea.sflag (!%p816_p12), [#allocation4], %s856_s9 }
  0x4e   : > { %s213_s10 = scalar_lea.vmem (!%p816_p12), [#allocation3], %s426_s11  ;;  %p936_p8 = scmp.ne.s32.totalorder (!%p816_p12), %s930_s25, 0 }
  0x53   : > { %625 = dma.done.wait (%p936_p8), %s210_s6, 128  }
  0x54   : > { %627 = vsyncadd (%p936_p8), %s210_s6, 4294967168  ;;  %s219_s29 = scalar_lea.sflag [#allocation7], %s856_s9  ;;  %s222_s12 = scalar_lea.vmem [#allocation6], %s426_s11 }
  0x55   : > { %629 = dma.done.wait (%p936_p8), %s219_s29, 128  }
  0x56   : > { %631 = vsyncadd (%p936_p8), %s219_s29, 4294967168  ;;  %v251_v0 = vld [vmem:[%s213_s10] sm:$0x3]  ;;  %v252_v1 = vld [vmem:[%s222_s12] sm:$0x3]  ;;  %s250_s13 = sld [smem:[#allocation2]] }
  0x57   : > { %v429_v2 = vld [vmem:[%s213_s10 + $0x2] sm:$0x3]  ;;  %v254_v3 = vmul.f32 %v251_v0, %v251_v0  ;;  %v255_v4 = vmul.f32 %v252_v1, %v252_v1  ;;  %v430_v5 = vld [vmem:[%s222_s12 + $0x2] sm:$0x3]  ;;  %v431_v7 = vld [vmem:[%s213_s10 + $0x4] sm:$0x3]  ;;  %v253_v19 = vmul.f32 %v252_v1, %v251_v0 }
  0x58   : > { %v263_v6 = vmul.f32 %v429_v2, %v429_v2  ;;  %v265_v9 = vmul.f32 %v430_v5, %v430_v5  ;;  %v432_v10 = vld [vmem:[%s222_s12 + $0x4] sm:$0x3]  ;;  %v273_v12 = vmul.f32 %v431_v7, %v431_v7  ;;  %v433_v13 = vld [vmem:[%s213_s10 + $0x6] sm:$0x3]  ;;  %v434_v16 = vld [vmem:[%s222_s12 + $0x6] sm:$0x3]  ;;  %v261_v20 = vmul.f32 %v430_v5, %v429_v2 }
  0x59   : > { %v256_v8 = vadd.f32 %v255_v4, %v254_v3  ;;  %v275_v15 = vmul.f32 %v432_v10, %v432_v10  ;;  %v283_v18 = vmul.f32 %v433_v13, %v433_v13  ;;  %v285_v22 = vmul.f32 %v434_v16, %v434_v16  ;;  %s428_s25 = sshll.u32 %s856_s9, 1  ;;  %s436_s5 = sshll.u32 %s650_s17, 5 }
  0x5a   : > { %v262_v24 = vadd.f32 %v261_v20, %v253_v19  ;;  %v271_v25 = vmul.f32 %v432_v10, %v431_v7  ;;  %v281_v30 = vmul.f32 %v434_v16, %v433_v13  ;;  %s249_s22 = scalar_lea.vmem [#allocation8], %s428_s25  ;;  %s876_s0 = scalar_lea.hbm %s926_s3, %s436_s5 }
  0x5b   : > { %v264_v11 = vadd.f32 %v263_v6, %v256_v8  ;;  %s309_s23 = sshll.u32 %s249_s22, 4  ;;  %s295_s30 = scalar_lea.sflag [#allocation5], %s856_s9  ;;  %s871_s23 = int_to_ptr.vmem [resolvable:$true] %s309_s23 }
  0x5c   : > { %v287_v26 = vstv %s250_s13  ;;  %v272_v29 = vadd.f32 %v271_v25, %v262_v24  ;;  %s572_s20 = scalar_lea.vmem %s871_s23, 32  ;;  %p937_p3 = scmp.ne.s32.totalorder %s931_s26, 0 }
  0x5d   : > { %v266_v14 = vadd.f32 %v265_v9, %v264_v11  ;;  %p573_p0 = scmp.ne.s32.totalorder %s871_s23, %s572_s20  ;;  %s664_s17 = smov [#allocation8]  }
  0x5e   : > { %v282_v31 = vadd.f32 %v281_v30, %v272_v29  ;;  %s576_s24 = sshll.u32 %s664_s17, 4  ;;  %s577_s24 = int_to_ptr.vmem [resolvable:$false] %s576_s24 }
  0x5f   : > { %v274_v17 = vadd.f32 %v273_v12, %v266_v14  ;;  %p574_p12 = pnand %p573_p0, %p937_p3  ;;  %s578_s4 = scalar_lea.vmem %s577_s24, 64 }
  0x60   : > { %v288_v32 = vadd.f32 %v287_v26, %v282_v31  ;;  %p579_p7 = scmp.lt.s32.totalorder %s871_s23, %s577_s24  ;;  %p580_p10 = scmp.lt.s32.totalorder %s578_s4, %s572_s20 }
  0x61   : > { %v276_v21 = vadd.f32 %v275_v15, %v274_v17  ;;  %p575_p13 = pneg %p574_p12 }
  0x62   : > { %p581_p9 = por %p580_p10, %p579_p7 }
  0x63   : > { %v284_v23 = vadd.f32 %v283_v18, %v276_v21 }
  0x64   : > { %p582_p11 = pnand %p581_p9, %p575_p13 }
  0x65   : > { %v286_v27 = vadd.f32 %v285_v22, %v284_v23 }
  0x67   : > { %v289_v28 = vadd.f32 %v287_v26, %v286_v27 }
  0x69   : > { %510 = vrcp.f32 %v289_v28 }
  0x73   : > { %v511_v33 = vpop.eup %510 }
  0x74   : > { %v291_v34 = vmul.f32 %v511_v33, %v288_v32 }
  0x76   : > { %v292_v35 = vsub.f32 1.0, %v291_v34 }
  0x78   : > { %293 = vst [vmem:[%s249_s22] sm:$0x3] %v292_v35 }
  0x79   : > { %585 = shalt.err (!%p582_p11)
}
  0x7a   : > { %s586_s9 = scalar_lea.hbm %s876_s0, 32  ;;  %s590_s10 = scalar_lea.hbm %s926_s3, 64 }
  0x7b   : > { %p587_p1 = scmp.ne.s32.totalorder %s876_s0, %s586_s9  ;;  %p591_p5 = scmp.lt.u32.totalorder %s876_s0, %s926_s3 }
  0x7c   : > { %p592_p4 = scmp.lt.u32.totalorder %s590_s10, %s586_s9  ;;  %p594_p0 = scmp.lt.u32.totalorder %s586_s9, %s876_s0 }
  0x7d   : > { %p588_p6 = pnand %p587_p1, %p937_p3 }
  0x7e   : > { %p593_p8 = por %p592_p4, %p591_p5 }
  0x7f   : > { %p589_p2 = pneg %p588_p6 }
  0x80   : > { %p595_p12 = por %p594_p0, %p593_p8 }
  0x82   : > { %p596_p13 = pnand %p595_p12, %p589_p2 }
  0x84   : > { %599 = shalt.err (!%p596_p13)
}
  0x85   : > { %445 = dma.vmem_to_hbm [thread:$0]  (%p937_p3), %s871_s23, 32, %s876_s0, %s295_s30  }
  0x86 PF: > { %s321_s13 = sand.u32 1, %s638_s14   ;;  %p938_p7 = scmp.ne.s32.totalorder %s932_s28, 0 }
  0x87   : > { %p939_p10 = scmp.ge.s32.totalorder %s658_s19, 2  ;;  %s322_s25 = scalar_lea.sflag [#allocation5], %s321_s13 }
  0x89   : > { %p455_p9 = pnand %p939_p10, %p938_p7 }
  0x8b   : > { %633 = dma.done.wait (!%p455_p9), %s322_s25, 32  }
  0x8c   : > { %635 = vsyncadd (!%p455_p9), %s322_s25, 4294967264  ;;  %s23_s19 = sadd.s32 1, %s658_s19   ;;  %s940_s14 = smov %s642_s15 }
  0x8d   : > { %p20_p11 = scmp.ge.s32.totalorder %s23_s19, 4   ;;  %s941_s15 = smov %s646_s16 }
  0x8e   : > { %s942_s16 = smov %s744_s27  ;;  %s943_s17 = smov %s654_s18 }
  0x8f   : > { %s944_s18 = smov %s946_s21  ;;  %22 = sbr.rel (!%p20_p11) target bundleno = 10 (0xa), region = 96 }
  0x96   :  { %327 = vsyncpa [#allocation4], 1 }
  0x97   :  { %329 = vsyncpa [#allocation4 + $0x1], 1 }
  0x98   :  { %330 = vsyncpa [#allocation7], 1 }
  0x99   :  { %332 = vsyncpa [#allocation7 + $0x1], 1 }
  0x9a   :  { %333 = vsyncpa [#allocation5], 1 }
  0x9b   :  { %335 = vsyncpa [#allocation5 + $0x1], 1 }

</bundles_post_ra>
